<compile_context>
chip_gen: v7x
topology: tpu7x:2x2x1
jax: 0.10.0
libtpu: 0.0.40
codegen_flags: <defaults>
</compile_context>

<pallas_src>
import numpy as np
import jax
import jax.numpy as jnp
from jax.experimental import pallas as pl
from jax.experimental.pallas import tpu as pltpu


# ----------------------------------------------------------------------------
# Bilinear interpolation matrix (PyTorch F.interpolate, mode='bilinear',
# align_corners=False) for one axis.
# ----------------------------------------------------------------------------
def make_bilinear_matrix(in_size: int, out_size: int) -> np.ndarray:
    scale = in_size / out_size
    o = np.arange(out_size)
    src = np.maximum((o + 0.5) * scale - 0.5, 0.0)
    i0 = np.minimum(np.floor(src).astype(np.int64), in_size - 1)
    i1 = np.minimum(i0 + 1, in_size - 1)
    w1 = (src - i0).astype(np.float32)
    w0 = (1.0 - w1).astype(np.float32)
    A = np.zeros((out_size, in_size), dtype=np.float32)
    np.add.at(A, (o, i0), w0)
    np.add.at(A, (o, i1), w1)
    return A


# ----------------------------------------------------------------------------
# Kernel. Per grid step (one batch element), channel-major layout:
#   x_ref     : (Cin, H*W)          bf16  flattened NCHW slice
#   wm_ref    : (Cout, Cin)         bf16  1x1 conv weight (PyTorch orientation)
#   scale_ref : (Cout, 1)           f32   folded BN scale
#   shift_ref : (Cout, 1)           f32   folded BN shift (incl. conv bias)
#   w1_ref    : (Cr, Cout), b1_ref: (Cr, 1)    SE squeeze conv (f32)
#   w2_ref    : (Cout, Cr), b2_ref: (Cout, 1)  SE excite conv (f32)
#   axT_ref   : (W, Wout)           bf16  width-upsample matrix (Ax^T)
#   ayB_ref   : (Cout, Hout, H)     bf16  height-upsample matrix, bcast over C
#   out_ref   : (Cout, Hout*Wout)   f32   lane-dense output (HWo % 128 == 0)
# ----------------------------------------------------------------------------
def make_fusion_kernel(use_attention, cout, h, w, hout, wout):
    inv_hw = 1.0 / float(h * w)

    def kernel(x_ref, wm_ref, scale_ref, shift_ref,
               w1_ref, b1_ref, w2_ref, b2_ref, axT_ref, ayB_ref, out_ref):
        # 1x1 conv as (Cout, Cin) @ (Cin, H*W) on the MXU; bf16 in, f32 acc.
        y = jnp.dot(wm_ref[...], x_ref[...], preferred_element_type=jnp.float32)
        # Folded eval-mode BatchNorm affine + ReLU (f32, VPU).
        y = y * scale_ref[...] + shift_ref[...]
        y = jnp.maximum(y, 0.0)                                    # (Cout, H*W)

        if use_attention:
            # SE: AdaptiveAvgPool2d(1) -> 1x1 -> ReLU -> 1x1 -> sigmoid (f32).
            pooled = jnp.sum(y, axis=1, keepdims=True) * inv_hw    # (Cout, 1)
            hh = jnp.dot(w1_ref[...], pooled,
                         preferred_element_type=jnp.float32) + b1_ref[...]
            hh = jnp.maximum(hh, 0.0)                              # (Cr, 1)
            att = jax.nn.sigmoid(
                jnp.dot(w2_ref[...], hh,
                        preferred_element_type=jnp.float32) + b2_ref[...])
            y = y * att                                            # bcast over H*W

        # Separable bilinear upsample (no dense kron matrix).
        cdt = axT_ref.dtype
        y3 = y.reshape(cout, h, w).astype(cdt)
        # Width direction: contract W against Ax^T -> (Cout, H, Wout).
        t = jnp.einsum('chw,wx->chx', y3, axT_ref[...],
                       preferred_element_type=jnp.float32)
        # Height direction: channel-batched contract H -> (Cout, Hout, Wout).
        o3 = jnp.einsum('coh,chx->cox', ayB_ref[...], t.astype(cdt),
                        preferred_element_type=jnp.float32)
        # Lane-dense store: last dim Hout*Wout is a multiple of 128.
        out_ref[...] = o3.reshape(cout, hout * wout)

    return kernel


# ----------------------------------------------------------------------------
# Wrapper
# ----------------------------------------------------------------------------
def fusion_block_forward(x_nchw, params, *, scale_factor=2, use_attention=True,
                         compute_dtype=jnp.bfloat16):
    N, Cin, H, W = x_nchw.shape
    Cout = params["w"].shape[0]
    Cr = params["w1"].shape[0]
    HW = H * W
    Hout, Wout = H * scale_factor, W * scale_factor
    HWo = Hout * Wout

    # Fold eval-mode BatchNorm (+ conv bias) into a per-channel affine.
    eps = 1e-5
    scale = params["gamma"] / jnp.sqrt(params["running_var"] + eps)
    shift = params["beta"] - params["running_mean"] * scale + params["b"] * scale
    scale2 = scale.reshape(Cout, 1).astype(jnp.float32)
    shift2 = shift.reshape(Cout, 1).astype(jnp.float32)

    # Separable bilinear interpolation matrices (tiny trace-time constants).
    Ay = make_bilinear_matrix(H, Hout)                       # (Hout, H)
    Ax = make_bilinear_matrix(W, Wout)                       # (Wout, W)
    axT = jnp.asarray(Ax.T, dtype=compute_dtype)             # (W, Wout)
    ayB = jnp.asarray(np.broadcast_to(Ay, (Cout, Hout, H)).copy(),
                      dtype=compute_dtype)                   # (Cout, Hout, H)

    # NCHW -> (N, Cin, H*W): trailing-dim merge, no data movement.
    x_flat = x_nchw.reshape(N, Cin, HW).astype(compute_dtype)
    wm = params["w"].astype(compute_dtype)                   # (Cout, Cin)
    w1 = params["w1"].astype(jnp.float32)
    w2 = params["w2"].astype(jnp.float32)
    b1 = params["b1"].reshape(Cr, 1).astype(jnp.float32)
    b2 = params["b2"].reshape(Cout, 1).astype(jnp.float32)

    flops = N * (2 * Cout * Cin * HW            # 1x1 conv
                 + 2 * Cout * H * W * Wout      # width upsample
                 + 2 * Cout * Hout * H * Wout   # height upsample
                 + 4 * Cr * Cout)               # SE convs
    cost = pl.CostEstimate(
        flops=flops,
        transcendentals=N * Cout,
        bytes_accessed=int(x_flat.size) * 2 + N * Cout * HWo * 4)

    def const2d(shape):
        return pl.BlockSpec(shape, lambda n: (0, 0))

    out_flat = pl.pallas_call(
        make_fusion_kernel(use_attention, Cout, H, W, Hout, Wout),
        out_shape=jax.ShapeDtypeStruct((N, Cout, HWo), jnp.float32),
        grid_spec=pltpu.PrefetchScalarGridSpec(
            num_scalar_prefetch=0,
            grid=(N,),
            in_specs=[
                pl.BlockSpec((pl.Squeezed(), Cin, HW), lambda n: (n, 0, 0)),
                const2d((Cout, Cin)),
                const2d((Cout, 1)),
                const2d((Cout, 1)),
                const2d((Cr, Cout)),
                const2d((Cr, 1)),
                const2d((Cout, Cr)),
                const2d((Cout, 1)),
                const2d((W, Wout)),
                pl.BlockSpec((Cout, Hout, H), lambda n: (0, 0, 0)),
            ],
            out_specs=pl.BlockSpec((pl.Squeezed(), Cout, HWo),
                                   lambda n: (n, 0, 0)),
        ),
        compiler_params=pltpu.CompilerParams(
            dimension_semantics=("parallel",)),
        cost_estimate=cost,
    )(x_flat, wm, scale2, shift2, w1, b1, w2, b2, axT, ayB)

    # (N, Cout, Hout*Wout) -> NCHW: trailing-dim split, no data movement.
    return out_flat.reshape(N, Cout, Hout, Wout)


# ----------------------------------------------------------------------------
# Pure-JAX reference mirroring the bf16 matmul-operand casts (f32 accumulate),
# so the kernel comparison stays tight while exercising the MXU bf16 path.
# ----------------------------------------------------------------------------
def fusion_block_reference(x_nchw, params, *, scale_factor=2, use_attention=True,
                           compute_dtype=jnp.bfloat16):
    N, Cin, H, W = x_nchw.shape
    eps = 1e-5
    scale = params["gamma"] / jnp.sqrt(params["running_var"] + eps)
    shift = params["beta"] - params["running_mean"] * scale + params["b"] * scale

    xc = x_nchw.astype(compute_dtype)
    wc = params["w"].astype(compute_dtype)                   # (Cout, Cin)
    y = jnp.einsum("oc,nchw->nohw", wc, xc, preferred_element_type=jnp.float32)
    y = y * scale[None, :, None, None] + shift[None, :, None, None]
    y = jnp.maximum(y, 0.0)
    if use_attention:
        pooled = jnp.mean(y, axis=(2, 3), keepdims=True)
        hh = jnp.einsum("rc,nchw->nrhw", params["w1"], pooled) \
             + params["b1"][None, :, None, None]
        hh = jnp.maximum(hh, 0.0)
        att = jax.nn.sigmoid(jnp.einsum("cr,nrhw->nchw", params["w2"], hh)
                             + params["b2"][None, :, None, None])
        y = y * att
    Ay = jnp.asarray(make_bilinear_matrix(H, H * scale_factor), compute_dtype)
    Ax = jnp.asarray(make_bilinear_matrix(W, W * scale_factor), compute_dtype)
    t = jnp.einsum("nchw,xw->nchx", y.astype(compute_dtype), Ax,
                   preferred_element_type=jnp.float32)
    out = jnp.einsum("oh,nchx->ncox", Ay, t.astype(compute_dtype),
                     preferred_element_type=jnp.float32)
    return out


def xavier_uniform(key, fan_in, fan_out, shape):
    bound = float(np.sqrt(6.0 / (fan_in + fan_out)))
    return jax.random.uniform(key, shape, jnp.float32, -bound, bound)


def init_params(key, in_channels, out_channels):
    cr = max(1, out_channels // 16)
    k = jax.random.split(key, 8)
    return {
        # 1x1 conv weights stored in PyTorch (Cout, Cin) orientation.
        "w":  xavier_uniform(k[0], in_channels, out_channels,
                             (out_channels, in_channels)),
        "b":  0.01 * jax.random.normal(k[1], (out_channels,), jnp.float32),
        # BatchNorm (eval mode).
        "gamma": jnp.ones((out_channels,), jnp.float32),
        "beta":  jnp.zeros((out_channels,), jnp.float32),
        "running_mean": 0.05 * jax.random.normal(k[2], (out_channels,), jnp.float32),
        "running_var":  jnp.ones((out_channels,), jnp.float32)
                        + 0.1 * jax.random.uniform(k[3], (out_channels,)),
        # SE attention convs.
        "w1": xavier_uniform(k[4], out_channels, cr, (cr, out_channels)),
        "b1": 0.01 * jax.random.normal(k[5], (cr,), jnp.float32),
        "w2": xavier_uniform(k[6], cr, out_channels, (out_channels, cr)),
        "b2": 0.01 * jax.random.normal(k[7], (out_channels,), jnp.float32),
    }


if __name__ == "__main__":
    # TODO(synk): BatchNorm is folded in eval mode (running stats); PyTorch
    # training-mode batch statistics are not reproduced here.
    N, Cin, Cout, H, W = 2, 4, 8, 16, 16
    scale_factor, use_attention = 2, True

    key = jax.random.PRNGKey(0)
    kx, kp = jax.random.split(key)
    x = jax.random.normal(kx, (N, Cin, H, W), jnp.float32)
    params = init_params(kp, Cin, Cout)

    out = fusion_block_forward(x, params, scale_factor=scale_factor,
                               use_attention=use_attention)
    out = jax.block_until_ready(out)
    assert out.shape == (N, Cout, H * scale_factor, W * scale_factor), out.shape

    ref = fusion_block_reference(x, params, scale_factor=scale_factor,
                                 use_attention=use_attention)
    np.testing.assert_allclose(np.asarray(out), np.asarray(ref),
                               rtol=2e-3, atol=2e-3)
    print("KERNEL_OK")
</pallas_src>

<mosaic_0001>
module attributes {stable_mosaic.version = 11 : i64} {
  func.func @kernel(%arg0: i32, %arg1: memref<1x4x256xbf16, #tpu.memory_space<vmem>>, %arg2: memref<8x4xbf16, #tpu.memory_space<vmem>>, %arg3: memref<8x1xf32, #tpu.memory_space<vmem>>, %arg4: memref<8x1xf32, #tpu.memory_space<vmem>>, %arg5: memref<1x8xf32, #tpu.memory_space<vmem>>, %arg6: memref<1x1xf32, #tpu.memory_space<vmem>>, %arg7: memref<8x1xf32, #tpu.memory_space<vmem>>, %arg8: memref<8x1xf32, #tpu.memory_space<vmem>>, %arg9: memref<16x32xbf16, #tpu.memory_space<vmem>>, %arg10: memref<8x32x16xbf16, #tpu.memory_space<vmem>>, %arg11: memref<1x8x1024xf32, #tpu.memory_space<vmem>>) attributes {dimension_semantics = [#tpu.dimension_semantics<parallel>], iteration_bounds = array<i64: 2>, scalar_prefetch = 0 : i64, scratch_operands = 0 : i64, tpu.core_type = #tpu.core_type<tc>, window_params = [{transform_indices = @transform_0, window_bounds = array<i64: 1, 4, 256>}, {pipeline_mode = #tpu.pipeline_mode<synchronous>, transform_indices = @transform_1, window_bounds = array<i64: 8, 4>}, {pipeline_mode = #tpu.pipeline_mode<synchronous>, transform_indices = @transform_2, window_bounds = array<i64: 8, 1>}, {pipeline_mode = #tpu.pipeline_mode<synchronous>, transform_indices = @transform_3, window_bounds = array<i64: 8, 1>}, {pipeline_mode = #tpu.pipeline_mode<synchronous>, transform_indices = @transform_4, window_bounds = array<i64: 1, 8>}, {pipeline_mode = #tpu.pipeline_mode<synchronous>, transform_indices = @transform_5, window_bounds = array<i64: 1, 1>}, {pipeline_mode = #tpu.pipeline_mode<synchronous>, transform_indices = @transform_6, window_bounds = array<i64: 8, 1>}, {pipeline_mode = #tpu.pipeline_mode<synchronous>, transform_indices = @transform_7, window_bounds = array<i64: 8, 1>}, {pipeline_mode = #tpu.pipeline_mode<synchronous>, transform_indices = @transform_8, window_bounds = array<i64: 16, 32>}, {pipeline_mode = #tpu.pipeline_mode<synchronous>, transform_indices = @transform_9, window_bounds = array<i64: 8, 32, 16>}, {transform_indices = @transform_10, window_bounds = array<i64: 1, 8, 1024>}]} {
    %c0 = arith.constant 0 : index
    %c0_0 = arith.constant 0 : index
    %0 = vector.load %arg2[%c0, %c0_0] : memref<8x4xbf16, #tpu.memory_space<vmem>>, vector<8x4xbf16>
    %c0_1 = arith.constant 0 : index
    %c0_2 = arith.constant 0 : index
    %c0_3 = arith.constant 0 : index
    %1 = vector.load %arg1[%c0_1, %c0_2, %c0_3] : memref<1x4x256xbf16, #tpu.memory_space<vmem>>, vector<1x4x256xbf16>
    %2 = vector.shape_cast %1 : vector<1x4x256xbf16> to vector<4x256xbf16>
    %cst = arith.constant dense<0.000000e+00> : vector<8x256xf32>
    %3 = tpu.matmul %0, %2, %cst {dimension_numbers = #tpu.dot_dimension_numbers<[1], [0], [0], [1], [0, 0, 1, 1], [], []>} : vector<8x4xbf16>, vector<4x256xbf16>, vector<8x256xf32> -> vector<8x256xf32>
    %c0_4 = arith.constant 0 : index
    %c0_5 = arith.constant 0 : index
    %4 = vector.load %arg3[%c0_4, %c0_5] : memref<8x1xf32, #tpu.memory_space<vmem>>, vector<8x1xf32>
    %5 = vector.broadcast %4 : vector<8x1xf32> to vector<8x256xf32>
    %6 = arith.mulf %3, %5 : vector<8x256xf32>
    %c0_6 = arith.constant 0 : index
    %c0_7 = arith.constant 0 : index
    %7 = vector.load %arg4[%c0_6, %c0_7] : memref<8x1xf32, #tpu.memory_space<vmem>>, vector<8x1xf32>
    %8 = vector.broadcast %7 : vector<8x1xf32> to vector<8x256xf32>
    %9 = arith.addf %6, %8 : vector<8x256xf32>
    %cst_8 = arith.constant 0.000000e+00 : f32
    %10 = vector.broadcast %cst_8 : f32 to vector<8x256xf32>
    %11 = arith.maximumf %9, %10 : vector<8x256xf32>
    %cst_9 = arith.constant dense<0.000000e+00> : vector<8xf32>
    %12 = vector.multi_reduction <add>, %11, %cst_9 [1] : vector<8x256xf32> to vector<8xf32>
    %13 = vector.shape_cast %12 : vector<8xf32> to vector<8x1xf32>
    %cst_10 = arith.constant 3.906250e-03 : f32
    %14 = vector.broadcast %cst_10 : f32 to vector<8x1xf32>
    %15 = arith.mulf %13, %14 : vector<8x1xf32>
    %c0_11 = arith.constant 0 : index
    %c0_12 = arith.constant 0 : index
    %16 = vector.load %arg5[%c0_11, %c0_12] : memref<1x8xf32, #tpu.memory_space<vmem>>, vector<1x8xf32>
    %cst_13 = arith.constant dense<0.000000e+00> : vector<1x1xf32>
    %17 = tpu.matmul %16, %15, %cst_13 {dimension_numbers = #tpu.dot_dimension_numbers<[1], [0], [0], [1], [0, 0, 1, 1], [], []>} : vector<1x8xf32>, vector<8x1xf32>, vector<1x1xf32> -> vector<1x1xf32>
    %c0_14 = arith.constant 0 : index
    %c0_15 = arith.constant 0 : index
    %18 = vector.load %arg6[%c0_14, %c0_15] : memref<1x1xf32, #tpu.memory_space<vmem>>, vector<1x1xf32>
    %19 = arith.addf %17, %18 : vector<1x1xf32>
    %cst_16 = arith.constant 0.000000e+00 : f32
    %20 = vector.broadcast %cst_16 : f32 to vector<1x1xf32>
    %21 = arith.maximumf %19, %20 : vector<1x1xf32>
    %c0_17 = arith.constant 0 : index
    %c0_18 = arith.constant 0 : index
    %22 = vector.load %arg7[%c0_17, %c0_18] : memref<8x1xf32, #tpu.memory_space<vmem>>, vector<8x1xf32>
    %cst_19 = arith.constant dense<0.000000e+00> : vector<8x1xf32>
    %23 = tpu.matmul %22, %21, %cst_19 {dimension_numbers = #tpu.dot_dimension_numbers<[1], [0], [0], [1], [0, 0, 1, 1], [], []>} : vector<8x1xf32>, vector<1x1xf32>, vector<8x1xf32> -> vector<8x1xf32>
    %c0_20 = arith.constant 0 : index
    %c0_21 = arith.constant 0 : index
    %24 = vector.load %arg8[%c0_20, %c0_21] : memref<8x1xf32, #tpu.memory_space<vmem>>, vector<8x1xf32>
    %25 = arith.addf %23, %24 : vector<8x1xf32>
    %26 = arith.negf %25 : vector<8x1xf32>
    %27 = math.exp %26 : vector<8x1xf32>
    %cst_22 = arith.constant 1.000000e+00 : f32
    %28 = vector.broadcast %cst_22 : f32 to vector<8x1xf32>
    %29 = arith.addf %28, %27 : vector<8x1xf32>
    %30 = arith.divf %28, %29 : vector<8x1xf32>
    %31 = vector.broadcast %30 : vector<8x1xf32> to vector<8x256xf32>
    %32 = arith.mulf %11, %31 : vector<8x256xf32>
    %33 = vector.shape_cast %32 : vector<8x256xf32> to vector<8x16x16xf32>
    %34 = arith.truncf %33 : vector<8x16x16xf32> to vector<8x16x16xbf16>
    %c0_23 = arith.constant 0 : index
    %c0_24 = arith.constant 0 : index
    %35 = vector.load %arg9[%c0_23, %c0_24] : memref<16x32xbf16, #tpu.memory_space<vmem>>, vector<16x32xbf16>
    "tpu.trace_start"() <{level = 10 : i32, message = "chw,wx->chx"}> : () -> ()
    %cst_25 = arith.constant dense<0.000000e+00> : vector<8x16x32xf32>
    %36 = tpu.matmul %34, %35, %cst_25 {dimension_numbers = #tpu.dot_dimension_numbers<[2], [0], [0, 1], [1], [0, 0, 0, 1, 1, 1], [], []>} : vector<8x16x16xbf16>, vector<16x32xbf16>, vector<8x16x32xf32> -> vector<8x16x32xf32>
    "tpu.trace_stop"() : () -> ()
    %c0_26 = arith.constant 0 : index
    %c0_27 = arith.constant 0 : index
    %c0_28 = arith.constant 0 : index
    %37 = vector.load %arg10[%c0_26, %c0_27, %c0_28] : memref<8x32x16xbf16, #tpu.memory_space<vmem>>, vector<8x32x16xbf16>
    %38 = arith.truncf %36 : vector<8x16x32xf32> to vector<8x16x32xbf16>
    "tpu.trace_start"() <{level = 10 : i32, message = "coh,chx->cox"}> : () -> ()
    %cst_29 = arith.constant dense<0.000000e+00> : vector<8x32x32xf32>
    %39 = tpu.matmul %37, %38, %cst_29 {dimension_numbers = #tpu.dot_dimension_numbers<[2], [1], [1], [2], [0, 0, 0, 1, 1, 2], [0], [0]>} : vector<8x32x16xbf16>, vector<8x16x32xbf16>, vector<8x32x32xf32> -> vector<8x32x32xf32>
    "tpu.trace_stop"() : () -> ()
    %40 = vector.shape_cast %39 : vector<8x32x32xf32> to vector<8x1024xf32>
    %c0_30 = arith.constant 0 : index
    %c0_31 = arith.constant 0 : index
    %c0_32 = arith.constant 0 : index
    %41 = vector.load %arg11[%c0_30, %c0_31, %c0_32] : memref<1x8x1024xf32, #tpu.memory_space<vmem>>, vector<1x8x1024xf32>
    %42 = vector.shape_cast %41 : vector<1x8x1024xf32> to vector<8x1024xf32>
    %43 = vector.shape_cast %40 : vector<8x1024xf32> to vector<1x8x1024xf32>
    tpu.vector_store %arg11[%c0_30, %c0_31, %c0_32], %43 {strides = array<i32>} : memref<1x8x1024xf32, #tpu.memory_space<vmem>>, vector<1x8x1024xf32>,
    return
  }
  func.func @transform_0(%arg0: i32) -> (i32, i32, i32) {
    %c0_i32 = arith.constant 0 : i32
    %c0_i32_0 = arith.constant 0 : i32
    %c0_i32_1 = arith.constant 0 : i32
    return %arg0, %c0_i32, %c0_i32_0 : i32, i32, i32
  }
  func.func @transform_1(%arg0: i32) -> (i32, i32) {
    %c0_i32 = arith.constant 0 : i32
    %c0_i32_0 = arith.constant 0 : i32
    %c0_i32_1 = arith.constant 0 : i32
    return %c0_i32, %c0_i32_0 : i32, i32
  }
  func.func @transform_2(%arg0: i32) -> (i32, i32) {
    %c0_i32 = arith.constant 0 : i32
    %c0_i32_0 = arith.constant 0 : i32
    %c0_i32_1 = arith.constant 0 : i32
    return %c0_i32, %c0_i32_0 : i32, i32
  }
  func.func @transform_3(%arg0: i32) -> (i32, i32) {
    %c0_i32 = arith.constant 0 : i32
    %c0_i32_0 = arith.constant 0 : i32
    %c0_i32_1 = arith.constant 0 : i32
    return %c0_i32, %c0_i32_0 : i32, i32
  }
  func.func @transform_4(%arg0: i32) -> (i32, i32) {
    %c0_i32 = arith.constant 0 : i32
    %c0_i32_0 = arith.constant 0 : i32
    %c0_i32_1 = arith.constant 0 : i32
    return %c0_i32, %c0_i32_0 : i32, i32
  }
  func.func @transform_5(%arg0: i32) -> (i32, i32) {
    %c0_i32 = arith.constant 0 : i32
    %c0_i32_0 = arith.constant 0 : i32
    %c0_i32_1 = arith.constant 0 : i32
    return %c0_i32, %c0_i32_0 : i32, i32
  }
  func.func @transform_6(%arg0: i32) -> (i32, i32) {
    %c0_i32 = arith.constant 0 : i32
    %c0_i32_0 = arith.constant 0 : i32
    %c0_i32_1 = arith.constant 0 : i32
    return %c0_i32, %c0_i32_0 : i32, i32
  }
  func.func @transform_7(%arg0: i32) -> (i32, i32) {
    %c0_i32 = arith.constant 0 : i32
    %c0_i32_0 = arith.constant 0 : i32
    %c0_i32_1 = arith.constant 0 : i32
    return %c0_i32, %c0_i32_0 : i32, i32
  }
  func.func @transform_8(%arg0: i32) -> (i32, i32) {
    %c0_i32 = arith.constant 0 : i32
    %c0_i32_0 = arith.constant 0 : i32
    %c0_i32_1 = arith.constant 0 : i32
    return %c0_i32, %c0_i32_0 : i32, i32
  }
  func.func @transform_9(%arg0: i32) -> (i32, i32, i32) {
    %c0_i32 = arith.constant 0 : i32
    %c0_i32_0 = arith.constant 0 : i32
    %c0_i32_1 = arith.constant 0 : i32
    %c0_i32_2 = arith.constant 0 : i32
    return %c0_i32, %c0_i32_0, %c0_i32_1 : i32, i32, i32
  }
  func.func @transform_10(%arg0: i32) -> (i32, i32, i32) {
    %c0_i32 = arith.constant 0 : i32
    %c0_i32_0 = arith.constant 0 : i32
    %c0_i32_1 = arith.constant 0 : i32
    return %arg0, %c0_i32, %c0_i32_0 : i32, i32, i32
  }
}

</mosaic_0001>

<bundles_post_ra>
// kernel: tpu_custom_call.1
= control target key start
LH: loop header
LB: loop body
LE: loop exit
PB: predicated region body
PF: predicated region fallthrough
CT: control target
= control target key end

     0   :  { %s3339_s0 = inlined_call_operand.vmem [shape: bf16[2,4,256], index: 0, kind: input, shape index: {}]   ;;  %s3340_s1 = inlined_call_operand.vmem [shape: bf16[8,4], index: 1, kind: input, shape index: {}]   ;;  %s3341_s2 = inlined_call_operand.vmem [shape: f32[8,1], index: 2, kind: input, shape index: {}]   ;;  %s3342_s3 = inlined_call_operand.vmem [shape: f32[8,1], index: 3, kind: input, shape index: {}]   ;;  %s3343_s4 = inlined_call_operand.vmem [shape: f32[1,8], index: 4, kind: input, shape index: {}]   ;;  %s3344_s5 = inlined_call_operand.<no memory space> [shape: f32[1,1], index: 5, kind: input, shape index: {}]   ;;  %s3345_s6 = inlined_call_operand.vmem [shape: f32[8,1], index: 6, kind: input, shape index: {}]   ;;  %s3346_s7 = inlined_call_operand.vmem [shape: f32[8,1], index: 7, kind: input, shape index: {}]   ;;  %s3347_s8 = inlined_call_operand.vmem [shape: bf16[16,32], index: 8, kind: input, shape index: {}]   ;;  %s3348_s9 = inlined_call_operand.vmem [shape: bf16[8,32,16], index: 9, kind: input, shape index: {}]   ;;  %s3349_s10 = inlined_call_operand.hbm [shape: f32[2,8,1024], index: 10, kind: output, shape index: {}]  }
   0x1   :  { %v15_v0 = vstv %s3344_s5 }
   0x2   :  { %16 = vst [vmem:[#allocation2] sm:$0x1] %v15_v0 }
   0x3   :  { %17 = vsyncpa [#allocation4], 0 }
   0x4   :  { %19 = vsyncpa [#allocation4 + $0x1], 0  ;;  %s2763_s15 = smov 0   ;;  %s2765_s16 = smov 0  }
   0x5   :  { %s2767_s17 = smov 0   ;;  %s2769_s18 = smov 0  }
   0x6 LB: > { %s2784_s5 = sadd.s32 4294967295, %s2690_s18   ;;  %s2379_s19 = sadd.s32 4294967294, %s2690_s18   ;;  %s2690_s18 = sphi %s2769_s18, %s3355_s18   ;;  %s2686_s17 = sphi %s2767_s17, %s3354_s17   ;;  %s2682_s16 = sphi %s2765_s16, %s3353_s16   ;;  %s2678_s15 = sphi %s2763_s15, %s3352_s15  }
   0x7   : > { %s2788_s20 = sadd.s32 1, %s2690_s18   ;;  %s247_s21 = sadd.s32 1, %s2686_s17 }
   0x8   : > { %s244_s22 = ssub.s32 %s2690_s18, %s2788_s20  ;;  %p257_p0 = scmp.ne.s32.totalorder %s2686_s17, %s2682_s16 }
   0x9   : > { %p245_p1 = scmp.eq.s32.totalorder %s244_s22, 0  ;;  %p258_p2 = scmp.eq.s32.totalorder %s2784_s5, 1 }
   0xa   : > { %p263_p3 = scmp.ne.s32.totalorder %s2682_s16, %s2678_s15  ;;  %p264_p4 = scmp.eq.s32.totalorder %s2379_s19, 1 }
   0xb   : > { %s2799_s23 = scalar_select %p245_p1, %s2686_s17, %s247_s21  }
   0xc   : > { %p2801_p5 = por %p258_p2, %p257_p0  ;;  %p2805_p6 = por %p264_p4, %p263_p3 }
   0xd   : > { %p2382_p7 = scmp.ge.s32.totalorder %s2690_s18, 1  ;;  %p317_p8 = scmp.lt.s32.totalorder %s2690_s18, 3 }
   0xf   : > { %p318_p9 = pnand %p2382_p7, %p317_p8 }
  0x10   : > { %p355_p10 = scmp.lt.s32.totalorder (!%p318_p9), %s2784_s5, 1  ;;  %v2692_v1 = vmov (!%p318_p9), 0   ;;  %v424_v2 = vld [vmem:[%s3341_s2] sm:$0xff] (!%p318_p9)  ;;  %vm376_vm0 = vcmask (!%p318_p9), 1041408   ;;  %vm372_vm1 = vcmask (!%p318_p9), 31744   ;;  %v2693_v21 = vmov (!%p318_p9), 0.0  }
  0x11   : > { %321 = sbr.rel (%p318_p9) target bundleno = 1807 (0x70f), region = 60  ;;  %415 = vmatprep.mubr.bf16.mxu0 (!%p318_p9), %v2692_v1  ;;  %2605 = vset.pattern.permute.xlu0 (!%p318_p9), %v2692_v1  ;;  %v432_v3 = vld [vmem:[%s3342_s3] sm:$0xff] (!%p318_p9)  ;;  %vm2694_vm2 = vmmov (!%p318_p9), 0   ;;  %vm448_vm3 = vcmask (!%p318_p9), 64512   ;;  %vm529_vm4 = vcmask (!%p318_p9), 1040384   ;;  %vm525_vm5 = vcmask (!%p318_p9), 7168  }
  0x12   : > { %427 = vperm.xlu0 (!%p318_p9), %2605, %v424_v2   ;;  %2606 = vset.pattern.permute.xlu1 (!%p318_p9), %v2692_v1  ;;  %v361_v7 = vld [vmem:[%s3340_s1] sm:$0xf] (!%p318_p9)  ;;  %s2696_s12 = smov (!%p318_p9), 112   ;;  %s2697_s13 = smov (!%p318_p9), 16   ;;  %v2702_v51 = vmov (!%p318_p9), 1983009808   ;;  %v665_v53 = vlaneseq (!%p318_p9) }
  0x13   : > { %2478 = vmatprep.subr.mxu1 (!%p318_p9), %v2693_v21  ;;  %2480 = vmatprep.mubr.msk.f32.mxu1 (!%p318_p9), %vm2694_vm2, %v2693_v21  ;;  %v446_v24 = vld [vmem:[%s3343_s4] sm:$0x1] (!%p318_p9)  ;;  %s2699_s19 = smov (!%p318_p9), 80   ;;  %s2700_s21 = smov (!%p318_p9), 64   ;;  %v663_v52 = vunpack.c.l.s4 (!%p318_p9), %v2702_v51  ;;  %v2703_v58 = vmov (!%p318_p9), 1934713408  }
  0x14   : > { %v447_v25 = vld [vmem:[#allocation2] sm:$0x1] (!%p318_p9)  ;;  %s2701_s22 = smov (!%p318_p9), 32   ;;  %v666_v56 = vshrl.u32 (!%p318_p9), %v665_v53, 7  ;;  %v727_v59 = vunpack.c.l.s4 (!%p318_p9), %v2703_v58  ;;  %vm948_vm6 = vcmask (!%p318_p9), 130048   ;;  %vm2270_vm7 = vcmask (!%p318_p9), 261120  }
  0x15   : > { %v523_v30 = vld [vmem:[%s3345_s6] sm:$0xff] (!%p318_p9)  ;;  %v664_v55 = vunpack.c.0.s8 (!%p318_p9), %v663_v52  ;;  %vm2272_vm8 = vcmask (!%p318_p9), 523264   ;;  %vm2274_vm9 = vcmask (!%p318_p9), 785408   ;;  %s2704_s30 = smov (!%p318_p9), [#allocation3]  }
  0x16   : > { %435 = vperm.xlu0 (!%p318_p9), %2605, %v432_v3   ;;  %v524_v31 = vld [vmem:[%s3346_s7] sm:$0xff] (!%p318_p9)  ;;  %v728_v2 = vunpack.c.0.s8 (!%p318_p9), %v727_v59 }
  0x17   : > { %v2607_v42 = vld [vmem:[%s3347_s8] sm:$0xff] (!%p318_p9)   ;;  %v2869_v63 = vsub.s32 (!%p318_p9), %v664_v55, %v666_v56 }
  0x18   : > { %s356_s28 = scalar_select %p355_p10, %s2784_s5, 1 }
  0x1a   : > { %s2439_s11 = sshll.u32 %s356_s28, 2 }
  0x1b   : > { %s359_s14 = scalar_lea.vmem %s3339_s0, %s2439_s11  ;;  %s2695_s11 = smov 48  }
  0x1c   : > { %v2386_v4 = vld.sshfl [vmem:[%s359_s14] sm:$0x33 pattern:$0x76325410]  ;;  %s2698_s14 = smov 96  }
  0x1d   : > { %v371_v5 = vcombine.high %v2386_v4, %v2386_v4  ;;  %v378_v6 = vsel %vm376_vm0, %v2386_v4, 0 }
  0x1f   : > { %2387 = vmatprep.subr.msk.bf16.mxu0 %vm376_vm0, %v371_v5 }
  0x20   : > { %384 = vmatpush1.bf16.msra.mxu0 %v378_v6 }
  0x23   : > { %2388 = vmatmul.mubr.msk.bf16.vlgmr.msra.gmra.mrb[0].mxu0 %vm372_vm1, %v361_v7 }
  0x91   : > { %v428_v8 = vpop.permute.xlu0 %427 }
  0x95   : > { %v436_v12 = vpop.permute.xlu0 %435 }
  0xf6   : > { %v417_v9 = vpop.f32.mrb[0].mxu0 }
  0xf7   : > { %v430_v10 = vmul.f32 %v428_v8, %v417_v9  ;;  %v419_v11 = vpop.f32.mrb[1].mxu0 }
  0xf8   : > { %v431_v13 = vmul.f32 %v428_v8, %v419_v11  ;;  %v421_v14 = vpop.f32.mrb[2].mxu0 }
  0xf9   : > { %v422_v15 = vpop.f32.mrb[3].mxu0  ;;  %v438_v16 = vadd.f32 %v436_v12, %v430_v10 }
  0xfa   : > { %v439_v17 = vadd.f32 %v436_v12, %v431_v13  ;;  %v2878_v12 = vsub.s32 %v728_v2, %v666_v56 }
  0xfb   : > { %v440_v18 = vmax.f32 %v438_v16, 0.0 }
  0xfc   : > { %v441_v19 = vmax.f32 %v439_v17, 0.0 }
  0xfe   : > { %v442_v20 = vadd.f32 %v441_v19, %v440_v18 }
 0x100   : > { %443 = vadd.xlane.f32.xlu1 %v442_v20 }
 0x18d   : > { %v444_v22 = vpop.xlane.xlu1 %443 }
 0x18e   : > { %v445_v23 = vmul.f32 0.00390625, %v444_v22 }
 0x190   : > { %2479 = vmatpush3.msra.mxu1 %v445_v23 }
 0x191   : > { %2481 = vmatmul.mubr.msk.f32.vlgmr.msra.gmra.mrb[0].mxu1 %vm448_vm3, %v446_v24  ;;  %2483 = vmatprep.subr.mxu1 %v2693_v21 }
 0x192   : > { %2485 = vmatprep.mubr.msk.f32.mxu1 %vm2694_vm2, %v2693_v21 }
 0x264   : > { %v518_v26 = vpop.f32.mrb[0].mxu1 }
 0x265   : > { %v519_v27 = vadd.f32 %v518_v26, %v447_v25  ;;  %v2482_v28 = vpop.f32.mrb[1].mxu1 }
 0x267   : > { %v522_v29 = vmax.f32 %v519_v27, 0.0 }
 0x269   : > { %2484 = vmatpush3.msk.msra.mxu1 %vm529_vm4, %v522_v29 }
 0x26a   : > { %2486 = vmatmul.mubr.msk.f32.vlgmr.msra.gmra.mrb[2].mxu1 %vm525_vm5, %v523_v30  ;;  %2488 = vmatprep.subr.bf16.mxu1 %v2607_v42 }
 0x26b   : > { %2489 = vmatpush3.bf16.msra.mxu1 %v2607_v42 }
 0x33d   : > { %v599_v32 = vpop.f32.mrb[2].mxu1 }
 0x33e   : > { %v600_v33 = vadd.f32 %v599_v32, %v524_v31  ;;  %v2487_v34 = vpop.f32.mrb[3].mxu1 }
 0x340   : > { %v2392_v35 = vmul.f32 -1.442695, %v600_v33 }
 0x342   : > { %2624 = vpow2.f32 %v2392_v35 }
 0x34c   : > { %v2625_v36 = vpop.eup %2624 }
 0x34d   : > { %v606_v37 = vadd.f32 1.0, %v2625_v36 }
 0x34f   : > { %2626 = vrcp.f32 %v606_v37 }
 0x359   : > { %v2627_v38 = vpop.eup %2626 }
 0x35a   : > { %611 = vperm.xlu1 %2606, %v2627_v38  }
 0x3d9   : > { %v612_v39 = vpop.permute.xlu1 %611 }
 0x3da   : > { %v2834_v40 = vmul.f32 %v612_v39, %v440_v18  ;;  %v2841_v41 = vmul.f32 %v612_v39, %v441_v19 }
 0x3dc   : > { %629 = vrot.lane.b32.xlu1 %v2834_v40, %s2695_s11  ;;  %617 = vrot.lane.b32.xlu0 %v2834_v40, %s2696_s12 }
 0x3e0   : > { %635 = vrot.lane.b32.xlu1 %v2834_v40, %s2697_s13  ;;  %620 = vrot.lane.b32.xlu0 %v2834_v40, %s2698_s14 }
 0x3e4   : > { %642 = vrot.lane.b32.xlu1 %v2841_v41, %s2698_s14  ;;  %623 = vrot.lane.b32.xlu0 %v2834_v40, %s2699_s19 }
 0x3e8   : > { %648 = vrot.lane.b32.xlu1 %v2841_v41, %s2700_s21  ;;  %626 = vrot.lane.b32.xlu0 %v2834_v40, %s2700_s21 }
 0x3ec   : > { %654 = vrot.lane.b32.xlu1 %v2841_v41, %s2701_s22  ;;  %632 = vrot.lane.b32.xlu0 %v2834_v40, %s2701_s22 }
 0x3f0   : > { %639 = vrot.lane.b32.xlu0 %v2841_v41, %s2696_s12 }
 0x3f4   : > { %645 = vrot.lane.b32.xlu0 %v2841_v41, %s2699_s19 }
 0x3f8   : > { %651 = vrot.lane.b32.xlu0 %v2841_v41, %s2695_s11  ;;  %s2632_s11 = sshll.u32 %s2704_s30, 4  ;;  %s2633_s11 = int_to_ptr.vmem [resolvable:$false] %s2632_s11 }
 0x3f9   : > { %s2634_s12 = scalar_lea.vmem %s2633_s11, 2048 }
 0x3fc   : > { %657 = vrot.lane.b32.xlu0 %v2841_v41, %s2697_s13  ;;  %s352_s13 = sand.u32 1, %s2682_s16  }
 0x3fd   : > { %s2306_s28 = scalar_lea.sflag [#allocation4], %s352_s13 }
 0x44e   : > { %v2861_v43 = vpop.permute.xlu0 %617  ;;  %v630_v44 = vpop.permute.xlu1 %629 }
 0x452   : > { %v2863_v45 = vpop.permute.xlu0 %620  ;;  %v636_v47 = vpop.permute.xlu1 %635 }
 0x453   : > { %v708_v0 = vcombine.low %v630_v44, %v636_v47  ;;  %v660_v1 = vcombine.low %v2834_v40, %v2863_v45  ;;  %v709_v4 = vcombine.high %v630_v44, %v636_v47  ;;  %v661_v16 = vcombine.high %v2834_v40, %v2863_v45 }
 0x455   : > { %v716_v10 = vrot.slane %v708_v0, %v2869_v63  ;;  %v668_v11 = vrot.slane %v660_v1, %v2869_v63  ;;  %v2882_v15 = vrot.slane %v709_v4, %v2869_v63  ;;  %v675_v56 = vrot.slane %v661_v16, %v2869_v63 }
 0x456   : > { %v2865_v46 = vpop.permute.xlu0 %623  ;;  %v643_v49 = vpop.permute.xlu1 %642 }
 0x457   : > { %v676_v62 = vcombine.low %v2861_v43, %v2865_v46  ;;  %v796_v8 = vcombine.low %v2841_v41, %v643_v49  ;;  %v797_v17 = vcombine.high %v2841_v41, %v643_v49  ;;  %v677_v33 = vcombine.high %v2861_v43, %v2865_v46 }
 0x459   : > { %v684_v9 = vrot.slane %v676_v62, %v2869_v63  ;;  %v804_v20 = vrot.slane %v796_v8, %v2869_v63  ;;  %v811_v32 = vrot.slane %v797_v17, %v2869_v63 }
 0x45a   : > { %v627_v48 = vpop.permute.xlu0 %626  ;;  %v649_v57 = vpop.permute.xlu1 %648 }
 0x45b   : > { %v724_v21 = vcombine.low %v668_v11, %v684_v9  ;;  %v725_v34 = vcombine.high %v668_v11, %v684_v9 }
 0x45d   : > { %v732_v36 = vrot.slane %v724_v21, %v2878_v12  ;;  %v739_v49 = vrot.slane %v725_v34, %v2878_v12 }
 0x45e   : > { %v633_v50 = vpop.permute.xlu0 %632  ;;  %v655_v5 = vpop.permute.xlu1 %654 }
 0x45f   : > { %v692_v60 = vcombine.low %v627_v48, %v633_v50  ;;  %v828_v13 = vcombine.low %v649_v57, %v655_v5  ;;  %v829_v24 = vcombine.high %v649_v57, %v655_v5  ;;  %v693_v25 = vcombine.high %v627_v48, %v633_v50 }
 0x460   : > { %v691_v48 = vrot.slane %v677_v33, %v2869_v63 }
 0x461   : > { %v700_v6 = vrot.slane %v692_v60, %v2869_v63  ;;  %v836_v28 = vrot.slane %v828_v13, %v2869_v63  ;;  %v843_v40 = vrot.slane %v829_v24, %v2869_v63  ;;  %v707_v41 = vrot.slane %v693_v25, %v2869_v63 }
 0x462   : > { %v640_v54 = vpop.permute.xlu0 %639  ;;  %v740_v62 = vcombine.low %v675_v56, %v691_v48 }
 0x463   : > { %v756_v18 = vcombine.low %v700_v6, %v716_v10  ;;  %v757_v26 = vcombine.high %v700_v6, %v716_v10  ;;  %v772_v57 = vcombine.low %v707_v41, %v2882_v15  ;;  %v773_v9 = vcombine.high %v707_v41, %v2882_v15 }
 0x464   : > { %v748_v5 = vrot.slane %v740_v62, %v2878_v12 }
 0x465   : > { %v764_v35 = vrot.slane %v756_v18, %v2878_v12  ;;  %v771_v42 = vrot.slane %v757_v26, %v2878_v12  ;;  %v780_v2 = vrot.slane %v772_v57, %v2878_v12  ;;  %v787_v18 = vrot.slane %v773_v9, %v2878_v12  ;;  %v2620_v57 = vld [vmem:[%s3348_s9 + $0x60] sm:$0xff]  }
 0x466   : > { %v646_v61 = vpop.permute.xlu0 %645 }
 0x467   : > { %v812_v3 = vcombine.low %v640_v54, %v646_v61  ;;  %v813_v27 = vcombine.high %v640_v54, %v646_v61  ;;  %v789_v50 = vcombine.high %v732_v36, %v764_v35  ;;  %v788_v51 = vcombine.low %v732_v36, %v764_v35 }
 0x468   : > { %v790_v61 = vcombine.low %v739_v49, %v771_v42  ;;  %v791_v8 = vcombine.high %v739_v49, %v771_v42  ;;  %v792_v11 = vcombine.low %v748_v5, %v780_v2  ;;  %v793_v15 = vcombine.high %v748_v5, %v780_v2  ;;  %v2618_v2 = vld [vmem:[%s3348_s9 + $0x50] sm:$0xff]   ;;  %v2623_v5 = vld [vmem:[%s3348_s9 + $0x78] sm:$0xff]  }
 0x469   : > { %v820_v14 = vrot.slane %v812_v3, %v2869_v63  ;;  %v827_v44 = vrot.slane %v813_v27, %v2869_v63 }
 0x46a   : > { %v652_v7 = vpop.permute.xlu0 %651 }
 0x46b   : > { %v860_v29 = vcombine.low %v804_v20, %v820_v14  ;;  %v861_v30 = vcombine.high %v804_v20, %v820_v14  ;;  %v876_v58 = vcombine.low %v811_v32, %v827_v44  ;;  %v877_v10 = vcombine.high %v811_v32, %v827_v44 }
 0x46c   : > { %v741_v14 = vcombine.high %v675_v56, %v691_v48 }
 0x46d   : > { %v868_v45 = vrot.slane %v860_v29, %v2878_v12  ;;  %v875_v43 = vrot.slane %v861_v30, %v2878_v12  ;;  %v884_v3 = vrot.slane %v876_v58, %v2878_v12  ;;  %v2608_v29 = vld [vmem:[%s3348_s9] sm:$0xff]  }
 0x46e   : > { %v658_v19 = vpop.permute.xlu0 %657  ;;  %v755_v21 = vrot.slane %v741_v14, %v2878_v12  ;;  %2508 = vmatprep.mubr.msk.bf16.mxu0 %vm948_vm6, %v2608_v29  ;;  %v2614_v30 = vld [vmem:[%s3348_s9 + $0x40] sm:$0xff]  }
 0x46f   : > { %v844_v22 = vcombine.low %v652_v7, %v658_v19  ;;  %v845_v23 = vcombine.high %v652_v7, %v658_v19  ;;  %v891_v19 = vrot.slane %v877_v10, %v2878_v12 }
 0x470   : > { %v795_v27 = vcombine.high %v755_v21, %v787_v18 }
 0x471   : > { %v852_v31 = vrot.slane %v844_v22, %v2869_v63  ;;  %v859_v37 = vrot.slane %v845_v23, %v2869_v63  ;;  %v794_v23 = vcombine.low %v755_v21, %v787_v18 }
 0x473   : > { %v892_v38 = vcombine.low %v836_v28, %v852_v31  ;;  %v893_v39 = vcombine.high %v836_v28, %v852_v31  ;;  %v908_v52 = vcombine.low %v843_v40, %v859_v37  ;;  %v909_v6 = vcombine.high %v843_v40, %v859_v37  ;;  %v2609_v37 = vld [vmem:[%s3348_s9 + $0x8] sm:$0xff]  }
 0x475   : > { %v900_v46 = vrot.slane %v892_v38, %v2878_v12  ;;  %v907_v47 = vrot.slane %v893_v39, %v2878_v12  ;;  %v916_v0 = vrot.slane %v908_v52, %v2878_v12  ;;  %v923_v16 = vrot.slane %v909_v6, %v2878_v12  ;;  %v2610_v38 = vld [vmem:[%s3348_s9 + $0x10] sm:$0xff]  }
 0x477   : > { %v925_v53 = vcombine.high %v868_v45, %v900_v46  ;;  %v924_v54 = vcombine.low %v868_v45, %v900_v46  ;;  %v926_v55 = vcombine.low %v875_v43, %v907_v47  ;;  %v927_v4 = vcombine.high %v875_v43, %v907_v47  ;;  %v2611_v43 = vld [vmem:[%s3348_s9 + $0x18] sm:$0xff]   ;;  %v2612_v46 = vld [vmem:[%s3348_s9 + $0x20] sm:$0xff]  }
 0x478   : > { %v928_v7 = vcombine.low %v884_v3, %v916_v0  ;;  %v929_v20 = vcombine.high %v884_v3, %v916_v0  ;;  %v930_v22 = vcombine.low %v891_v19, %v923_v16  ;;  %v931_v26 = vcombine.high %v891_v19, %v923_v16  ;;  %v2617_v0 = vld [vmem:[%s3348_s9 + $0x38] sm:$0xff]  }
 0x479   : > { %v933_v59 = vpack.c.bf16 %v925_v53, %v789_v50  ;;  %v932_v60 = vpack.c.bf16 %v924_v54, %v788_v51  ;;  %v934_v1 = vpack.c.bf16 %v926_v55, %v790_v61  ;;  %v935_v13 = vpack.c.bf16 %v927_v4, %v791_v8  ;;  %v2613_v53 = vld [vmem:[%s3348_s9 + $0x28] sm:$0xff]   ;;  %v2616_v55 = vld [vmem:[%s3348_s9 + $0x30] sm:$0xff]   ;;  %v2619_v3 = vld [vmem:[%s3348_s9 + $0x58] sm:$0xff]  }
 0x47a   : > { %v936_v17 = vpack.c.bf16 %v928_v7, %v792_v11  ;;  %v937_v24 = vpack.c.bf16 %v929_v20, %v793_v15  ;;  %v938_v25 = vpack.c.bf16 %v930_v22, %v794_v23  ;;  %v939_v28 = vpack.c.bf16 %v931_v26, %v795_v27  ;;  %v2615_v54 = vld [vmem:[%s3348_s9 + $0x48] sm:$0xff]   ;;  %v2621_v4 = vld [vmem:[%s3348_s9 + $0x70] sm:$0xff]  }
 0x47b   : > { %2490 = vmatprep.mubr.msk.bf16.mxu1 %vm948_vm6, %v932_v60 }
 0x47c   : > { %2491 = vmatmul.mubr.msk.bf16.vlgmr.msra.gmra.mrb[4].mxu1 %vm948_vm6, %v933_v59 }
 0x47d   : > { %2494 = vmatprep.mubr.msk.bf16.mxu1 %vm948_vm6, %v934_v1  ;;  %v2622_v1 = vld [vmem:[%s3348_s9 + $0x68] sm:$0xff]  }
 0x484   : > { %2495 = vmatmul.mubr.msk.bf16.gmra.mrb[8].mxu1 %vm948_vm6, %v935_v13 }
 0x485   : > { %2498 = vmatprep.mubr.msk.bf16.mxu1 %vm948_vm6, %v936_v17 }
 0x48c   : > { %2499 = vmatmul.mubr.msk.bf16.gmra.mrb[12].mxu1 %vm948_vm6, %v937_v24 }
 0x48d   : > { %2502 = vmatprep.mubr.msk.bf16.mxu1 %vm948_vm6, %v938_v25 }
 0x494   : > { %2503 = vmatmul.mubr.msk.bf16.gmra.mrb[16].mxu1 %vm948_vm6, %v939_v28 }
 0x495   : > { %2532 = vmatprep.mubr.msk.bf16.mxu1 %vm948_vm6, %v2614_v30 }
 0x54f   : > { %v2492_v31 = vpop.f32.mrb[4].mxu1 }
 0x550   : > { %v1007_v32 = vpop.f32.mrb[5].mxu1 }
 0x551   : > { %v2493_v33 = vpop.f32.mrb[6].mxu1 }
 0x552   : > { %v1103_v34 = vpack.c.bf16 %v2493_v33, %v2492_v31  ;;  %v1010_v35 = vpop.f32.mrb[7].mxu1 }
 0x553   : > { %v1102_v36 = vpack.c.bf16 %v1010_v35, %v1007_v32 }
 0x555   : > { %2506 = vmatprep.subr.bf16.mxu0 %v1102_v36 }
 0x556   : > { %2507 = vmatpush3.bf16.msra.mxu0 %v1102_v36 }
 0x557   : > { %v2496_v39 = vpop.f32.mrb[8].mxu1  ;;  %2512 = vmatprep.subr.bf16.mxu0 %v1103_v34 }
 0x558   : > { %v1023_v40 = vpop.f32.mrb[9].mxu1 }
 0x559   : > { %v2497_v41 = vpop.f32.mrb[10].mxu1  ;;  %2509 = vmatmul.mubr.msk.bf16.vlgmr.msra.gmra.mrb[4].mxu0 %vm948_vm6, %v2609_v37 }
 0x55a   : > { %v1105_v42 = vpack.c.bf16 %v2497_v41, %v2496_v39  ;;  %v1026_v44 = vpop.f32.mrb[11].mxu1  ;;  %2513 = vmatpush3.bf16.msra.mxu0 %v1103_v34  ;;  %2514 = vmatprep.mubr.msk.bf16.mxu0 %vm948_vm6, %v2610_v38 }
 0x55b   : > { %v1104_v45 = vpack.c.bf16 %v1026_v44, %v1023_v40 }
 0x55d   : > { %2518 = vmatprep.subr.bf16.mxu0 %v1104_v45 }
 0x55f   : > { %v2500_v47 = vpop.f32.mrb[12].mxu1 }
 0x560   : > { %v1039_v48 = vpop.f32.mrb[13].mxu1 }
 0x561   : > { %v2501_v49 = vpop.f32.mrb[14].mxu1  ;;  %2515 = vmatmul.mubr.msk.bf16.vlgmr.msra.gmra.mrb[8].mxu0 %vm948_vm6, %v2611_v43 }
 0x562   : > { %v1107_v50 = vpack.c.bf16 %v2501_v49, %v2500_v47  ;;  %2519 = vmatpush3.bf16.msra.mxu0 %v1104_v45  ;;  %v1042_v51 = vpop.f32.mrb[15].mxu1  ;;  %2520 = vmatprep.mubr.msk.bf16.mxu0 %vm948_vm6, %v2612_v46 }
 0x563   : > { %v1106_v52 = vpack.c.bf16 %v1042_v51, %v1039_v48  ;;  %2524 = vmatprep.subr.bf16.mxu0 %v1105_v42 }
 0x565   : > { %2530 = vmatprep.subr.bf16.mxu1 %v1106_v52 }
 0x566   : > { %2531 = vmatpush3.bf16.msra.mxu1 %v1106_v52 }
 0x567   : > { %v2504_v56 = vpop.f32.mrb[16].mxu1 }
 0x568   : > { %v1055_v58 = vpop.f32.mrb[17].mxu1 }
 0x569   : > { %v2505_v59 = vpop.f32.mrb[18].mxu1  ;;  %2521 = vmatmul.mubr.msk.bf16.vlgmr.msra.gmra.mrb[12].mxu0 %vm948_vm6, %v2613_v53  ;;  %2533 = vmatmul.mubr.msk.bf16.vlgmr.msra.gmra.mrb[20].mxu1 %vm948_vm6, %v2615_v54 }
 0x56a   : > { %v1109_v60 = vpack.c.bf16 %v2505_v59, %v2504_v56  ;;  %2525 = vmatpush3.bf16.msra.mxu0 %v1105_v42  ;;  %v1058_v61 = vpop.f32.mrb[19].mxu1  ;;  %2526 = vmatprep.mubr.msk.bf16.mxu0 %vm948_vm6, %v2616_v55 }
 0x56b   : > { %v1108_v62 = vpack.c.bf16 %v1058_v61, %v1055_v58  ;;  %2536 = vmatprep.subr.bf16.mxu0 %v1107_v50  ;;  %2544 = vmatprep.mubr.msk.bf16.mxu1 %vm948_vm6, %v2620_v57 }
 0x56d   : > { %2542 = vmatprep.subr.bf16.mxu1 %v1108_v62 }
 0x56e   : > { %2543 = vmatpush3.bf16.msra.mxu1 %v1108_v62 }
 0x571   : > { %2527 = vmatmul.mubr.msk.bf16.vlgmr.msra.gmra.mrb[16].mxu0 %vm948_vm6, %v2617_v0  ;;  %2545 = vmatmul.mubr.msk.bf16.vlgmr.msra.gmra.mrb[24].mxu1 %vm948_vm6, %v2622_v1 }
 0x572   : > { %2537 = vmatpush3.bf16.msra.mxu0 %v1107_v50  ;;  %2538 = vmatprep.mubr.msk.bf16.mxu0 %vm948_vm6, %v2618_v2 }
 0x573   : > { %2548 = vmatprep.subr.bf16.mxu0 %v1109_v60 }
 0x579   : > { %2539 = vmatmul.mubr.msk.bf16.vlgmr.msra.gmra.mrb[20].mxu0 %vm948_vm6, %v2619_v3 }
 0x57a   : > { %2549 = vmatpush3.bf16.msra.mxu0 %v1109_v60  ;;  %2550 = vmatprep.mubr.msk.bf16.mxu0 %vm948_vm6, %v2621_v4 }
 0x581   : > { %2551 = vmatmul.mubr.msk.bf16.vlgmr.msra.gmra.mrb[24].mxu0 %vm948_vm6, %v2623_v5 }
 0x62c   : > { %v2510_v6 = vpop.f32.mrb[4].mxu0 }
 0x62d   : > { %v1160_v7 = vpop.f32.mrb[5].mxu0 }
 0x62e   : > { %v2511_v8 = vpop.f32.mrb[6].mxu0 }
 0x62f   : > { %v2989_v9 = vpop.f32.mrb[7].mxu0 }
 0x634   : > { %v2516_v10 = vpop.f32.mrb[8].mxu0 }
 0x635   : > { %v1225_v11 = vpop.f32.mrb[9].mxu0 }
 0x636   : > { %v2517_v13 = vpop.f32.mrb[10].mxu0 }
 0x637   : > { %v1228_v14 = vpop.f32.mrb[11].mxu0 }
 0x63c   : > { %v2522_v16 = vpop.f32.mrb[12].mxu0  ;;  %v2991_v17 = vpop.f32.mrb[20].mxu1 }
 0x63d   : > { %v1902_v18 = vcombine.low %v2510_v6, %v2522_v16  ;;  %v1903_v19 = vcombine.high %v2510_v6, %v2522_v16  ;;  %v1290_v20 = vpop.f32.mrb[13].mxu0  ;;  %v2993_v21 = vpop.f32.mrb[21].mxu1 }
 0x63e   : > { %v1630_v22 = vcombine.low %v1160_v7, %v1290_v20  ;;  %v1631_v15 = vcombine.high %v1160_v7, %v1290_v20  ;;  %v2523_v23 = vpop.f32.mrb[14].mxu0  ;;  %v2995_v24 = vpop.f32.mrb[22].mxu1 }
 0x63f   : > { %v2038_v25 = vcombine.low %v2511_v8, %v2523_v23  ;;  %v2039_v26 = vcombine.high %v2511_v8, %v2523_v23  ;;  %v1293_v27 = vpop.f32.mrb[15].mxu0  ;;  %v2997_v28 = vpop.f32.mrb[23].mxu1  ;;  %v3002_v31 = vrot.slane %v1902_v18, %v2869_v63  ;;  %v3005_v32 = vrot.slane %v1903_v19, %v2869_v63 }
 0x640   : > { %v1766_v29 = vcombine.low %v2989_v9, %v1293_v27  ;;  %v1767_v30 = vcombine.high %v2989_v9, %v1293_v27  ;;  %v3008_v33 = vrot.slane %v1630_v22, %v2869_v63  ;;  %v3011_v34 = vrot.slane %v1631_v15, %v2869_v63 }
 0x641   : > { %v3014_v35 = vrot.slane %v2038_v25, %v2869_v63  ;;  %v3017_v36 = vrot.slane %v2039_v26, %v2869_v63 }
 0x644   : > { %v2528_v37 = vpop.f32.mrb[16].mxu0  ;;  %v2546_v38 = vpop.f32.mrb[24].mxu1 }
 0x645   : > { %v1918_v39 = vcombine.low %v2516_v10, %v2528_v37  ;;  %v1919_v40 = vcombine.high %v2516_v10, %v2528_v37  ;;  %v1355_v41 = vpop.f32.mrb[17].mxu0  ;;  %v1934_v42 = vcombine.low %v2991_v17, %v2546_v38  ;;  %v1935_v44 = vcombine.high %v2991_v17, %v2546_v38  ;;  %v1550_v45 = vpop.f32.mrb[25].mxu1 }
 0x646   : > { %v1646_v43 = vcombine.low %v1225_v11, %v1355_v41  ;;  %v1647_v46 = vcombine.high %v1225_v11, %v1355_v41  ;;  %v2529_v47 = vpop.f32.mrb[18].mxu0  ;;  %v1662_v48 = vcombine.low %v2993_v21, %v1550_v45  ;;  %v1663_v49 = vcombine.high %v2993_v21, %v1550_v45  ;;  %v2547_v50 = vpop.f32.mrb[26].mxu1 }
 0x647   : > { %v1926_v51 = vrot.slane %v1918_v39, %v2869_v63  ;;  %v1933_v52 = vrot.slane %v1919_v40, %v2869_v63  ;;  %v2054_v53 = vcombine.low %v2517_v13, %v2529_v47  ;;  %v2055_v54 = vcombine.high %v2517_v13, %v2529_v47  ;;  %v1358_v55 = vpop.f32.mrb[19].mxu0  ;;  %v1553_v56 = vpop.f32.mrb[27].mxu1 }
 0x648   : > { %v1654_v57 = vrot.slane %v1646_v43, %v2869_v63  ;;  %v1661_v58 = vrot.slane %v1647_v46, %v2869_v63  ;;  %v1782_v59 = vcombine.low %v1228_v14, %v1358_v55  ;;  %v1783_v60 = vcombine.high %v1228_v14, %v1358_v55 }
 0x649   : > { %v1966_v61 = vcombine.low %v3002_v31, %v1926_v51  ;;  %v1967_v62 = vcombine.high %v3002_v31, %v1926_v51  ;;  %v1982_v0 = vcombine.low %v3005_v32, %v1933_v52  ;;  %v1983_v1 = vcombine.high %v3005_v32, %v1933_v52 }
 0x64a   : > { %v1694_v2 = vcombine.low %v3008_v33, %v1654_v57  ;;  %v1695_v3 = vcombine.high %v3008_v33, %v1654_v57  ;;  %v1710_v4 = vcombine.low %v3011_v34, %v1661_v58  ;;  %v1711_v5 = vcombine.high %v3011_v34, %v1661_v58 }
 0x64b   : > { %v2062_v6 = vrot.slane %v2054_v53, %v2869_v63  ;;  %v2069_v7 = vrot.slane %v2055_v54, %v2869_v63  ;;  %v1790_v8 = vrot.slane %v1782_v59, %v2869_v63  ;;  %v1797_v9 = vrot.slane %v1783_v60, %v2869_v63 }
 0x64c   : > { %v1774_v10 = vrot.slane %v1766_v29, %v2869_v63  ;;  %v1781_v11 = vrot.slane %v1767_v30, %v2869_v63  ;;  %v2540_v13 = vpop.f32.mrb[20].mxu0  ;;  %v2070_v26 = vcombine.low %v2995_v24, %v2547_v50  ;;  %v2071_v27 = vcombine.high %v2995_v24, %v2547_v50 }
 0x64d   : > { %v2102_v14 = vcombine.low %v3014_v35, %v2062_v6  ;;  %v2103_v16 = vcombine.high %v3014_v35, %v2062_v6  ;;  %v2118_v17 = vcombine.low %v3017_v36, %v2069_v7  ;;  %v2119_v18 = vcombine.high %v3017_v36, %v2069_v7  ;;  %v1485_v19 = vpop.f32.mrb[21].mxu0 }
 0x64e   : > { %v1830_v20 = vcombine.low %v1774_v10, %v1790_v8  ;;  %v1831_v21 = vcombine.high %v1774_v10, %v1790_v8  ;;  %v1846_v22 = vcombine.low %v1781_v11, %v1797_v9  ;;  %v1847_v15 = vcombine.high %v1781_v11, %v1797_v9  ;;  %v2541_v23 = vpop.f32.mrb[22].mxu0 }
 0x64f   : > { %v1488_v25 = vpop.f32.mrb[23].mxu0  ;;  %v1798_v29 = vcombine.low %v2997_v28, %v1553_v56  ;;  %v1799_v30 = vcombine.high %v2997_v28, %v1553_v56  ;;  %v1942_v31 = vrot.slane %v1934_v42, %v2869_v63  ;;  %v1949_v32 = vrot.slane %v1935_v44, %v2869_v63 }
 0x650   : > { %v3052_v33 = vrot.slane %v1662_v48, %v2869_v63  ;;  %v3055_v34 = vrot.slane %v1663_v49, %v2869_v63  ;;  %v3058_v35 = vrot.slane %v1982_v0, %v2878_v12  ;;  %v3061_v36 = vrot.slane %v1966_v61, %v2878_v12 }
 0x651   : > { %v3064_v24 = vrot.slane %v1983_v1, %v2878_v12  ;;  %v3067_v28 = vrot.slane %v1967_v62, %v2878_v12  ;;  %v3070_v37 = vrot.slane %v2070_v26, %v2869_v63  ;;  %v3073_v38 = vrot.slane %v2071_v27, %v2869_v63 }
 0x652   : > { %v3076_v39 = vrot.slane %v1798_v29, %v2869_v63  ;;  %v3079_v40 = vrot.slane %v1799_v30, %v2869_v63  ;;  %v3082_v41 = vrot.slane %v1710_v4, %v2878_v12  ;;  %v3085_v42 = vrot.slane %v1694_v2, %v2878_v12 }
 0x653   : > { %v3088_v44 = vrot.slane %v1711_v5, %v2878_v12  ;;  %v3091_v45 = vrot.slane %v1695_v3, %v2878_v12  ;;  %v3094_v46 = vrot.slane %v2118_v17, %v2878_v12  ;;  %v3097_v47 = vrot.slane %v2102_v14, %v2878_v12 }
 0x654   : > { %v2552_v43 = vpop.f32.mrb[24].mxu0  ;;  %v3100_v48 = vrot.slane %v2119_v18, %v2878_v12  ;;  %v3103_v49 = vrot.slane %v2103_v16, %v2878_v12  ;;  %v3106_v53 = vrot.slane %v1846_v22, %v2878_v12  ;;  %v3109_v54 = vrot.slane %v1830_v20, %v2878_v12 }
 0x655   : > { %v1950_v50 = vcombine.low %v2540_v13, %v2552_v43  ;;  %v1951_v51 = vcombine.high %v2540_v13, %v2552_v43  ;;  %v1615_v52 = vpop.f32.mrb[25].mxu0  ;;  %v3112_v58 = vrot.slane %v1847_v15, %v2878_v12  ;;  %v3115_v59 = vrot.slane %v1831_v21, %v2878_v12 }
 0x656   : > { %v1678_v55 = vcombine.low %v1485_v19, %v1615_v52  ;;  %v1679_v56 = vcombine.high %v1485_v19, %v1615_v52  ;;  %v2553_v57 = vpop.f32.mrb[26].mxu0 }
 0x657   : > { %v1958_v60 = vrot.slane %v1950_v50, %v2869_v63  ;;  %v1965_v61 = vrot.slane %v1951_v51, %v2869_v63  ;;  %v2086_v62 = vcombine.low %v2541_v23, %v2553_v57  ;;  %v2087_v0 = vcombine.high %v2541_v23, %v2553_v57  ;;  %v1618_v1 = vpop.f32.mrb[27].mxu0 }
 0x658   : > { %v1686_v2 = vrot.slane %v1678_v55, %v2869_v63  ;;  %v1693_v3 = vrot.slane %v1679_v56, %v2869_v63  ;;  %v1814_v4 = vcombine.low %v1488_v25, %v1618_v1  ;;  %v1815_v5 = vcombine.high %v1488_v25, %v1618_v1 }
 0x659   : > { %v1998_v6 = vcombine.low %v1942_v31, %v1958_v60  ;;  %v1999_v7 = vcombine.high %v1942_v31, %v1958_v60  ;;  %v2014_v8 = vcombine.low %v1949_v32, %v1965_v61  ;;  %v2015_v9 = vcombine.high %v1949_v32, %v1965_v61 }
 0x65a   : > { %v1726_v10 = vcombine.low %v3052_v33, %v1686_v2  ;;  %v1727_v11 = vcombine.high %v3052_v33, %v1686_v2  ;;  %v1742_v13 = vcombine.low %v3055_v34, %v1693_v3  ;;  %v1743_v14 = vcombine.high %v3055_v34, %v1693_v3 }
 0x65b   : > { %v2094_v16 = vrot.slane %v2086_v62, %v2869_v63  ;;  %v2101_v17 = vrot.slane %v2087_v0, %v2869_v63  ;;  %v1822_v18 = vrot.slane %v1814_v4, %v2869_v63  ;;  %v1829_v19 = vrot.slane %v1815_v5, %v2869_v63 }
 0x65c   : > { %v3130_v20 = vrot.slane %v2014_v8, %v2878_v12  ;;  %v3133_v21 = vrot.slane %v1998_v6, %v2878_v12  ;;  %v2029_v22 = vrot.slane %v2015_v9, %v2878_v12  ;;  %v2013_v15 = vrot.slane %v1999_v7, %v2878_v12 }
 0x65d   : > { %v2134_v23 = vcombine.low %v3070_v37, %v2094_v16  ;;  %v2135_v25 = vcombine.high %v3070_v37, %v2094_v16  ;;  %v2150_v26 = vcombine.low %v3073_v38, %v2101_v17  ;;  %v2151_v27 = vcombine.high %v3073_v38, %v2101_v17 }
 0x65e   : > { %v1862_v63 = vcombine.low %v3076_v39, %v1822_v18  ;;  %v1863_v29 = vcombine.high %v3076_v39, %v1822_v18  ;;  %v1878_v30 = vcombine.low %v3079_v40, %v1829_v19  ;;  %v1879_v31 = vcombine.high %v3079_v40, %v1829_v19 }
 0x65f   : > { %v2035_v32 = vcombine.high %v3058_v35, %v3130_v20  ;;  %v2031_v33 = vcombine.high %v3061_v36, %v3133_v21  ;;  %v2036_v34 = vcombine.low %v3064_v24, %v2029_v22  ;;  %v2032_v37 = vcombine.low %v3067_v28, %v2013_v15 }
 0x660   : > { %v2037_v38 = vcombine.high %v3064_v24, %v2029_v22  ;;  %v2033_v43 = vcombine.high %v3067_v28, %v2013_v15  ;;  %v3154_v39 = vrot.slane %v1742_v13, %v2878_v12  ;;  %v3157_v50 = vrot.slane %v1726_v10, %v2878_v12 }
 0x661   : > { %2235 = vrot.lane.b32.xlu0 %v2035_v32, %s2701_s22  ;;  %2223 = vrot.lane.b32.xlu1 %v2031_v33, %s2701_s22  ;;  %v1757_v40 = vrot.slane %v1743_v14, %v2878_v12  ;;  %v1741_v51 = vrot.slane %v1727_v11, %v2878_v12  ;;  %v3164_v52 = vrot.slane %v2150_v26, %v2878_v12 }
 0x662   : > { %v1763_v24 = vcombine.high %v3082_v41, %v3154_v39  ;;  %v1759_v28 = vcombine.high %v3085_v42, %v3157_v50  ;;  %v3171_v55 = vrot.slane %v2134_v23, %v2878_v12  ;;  %v2165_v56 = vrot.slane %v2151_v27, %v2878_v12 }
 0x663   : > { %v1764_v57 = vcombine.low %v3088_v44, %v1757_v40  ;;  %v1760_v60 = vcombine.low %v3091_v45, %v1741_v51  ;;  %v1765_v61 = vcombine.high %v3088_v44, %v1757_v40  ;;  %v1761_v62 = vcombine.high %v3091_v45, %v1741_v51 }
 0x664   : > { %v2171_v0 = vcombine.high %v3094_v46, %v3164_v52  ;;  %v2167_v1 = vcombine.high %v3097_v47, %v3171_v55  ;;  %v2172_v2 = vcombine.low %v3100_v48, %v2165_v56  ;;  %v2149_v3 = vrot.slane %v2135_v25, %v2878_v12 }
 0x665   : > { %2239 = vrot.lane.b32.xlu0 %v2036_v34, %s2700_s21  ;;  %2227 = vrot.lane.b32.xlu1 %v2032_v37, %s2700_s21  ;;  %v3187_v4 = vrot.slane %v1878_v30, %v2878_v12  ;;  %v3190_v44 = vrot.slane %v1862_v63, %v2878_v12  ;;  %v1893_v45 = vrot.slane %v1879_v31, %v2878_v12 }
 0x666   : > { %v2168_v5 = vcombine.low %v3103_v49, %v2149_v3  ;;  %v1877_v6 = vrot.slane %v1863_v29, %v2878_v12  ;;  %v2173_v7 = vcombine.high %v3100_v48, %v2165_v56  ;;  %v2169_v8 = vcombine.high %v3103_v49, %v2149_v3 }
 0x667   : > { %v1899_v9 = vcombine.high %v3106_v53, %v3187_v4  ;;  %v1895_v10 = vcombine.high %v3109_v54, %v3190_v44  ;;  %v1900_v11 = vcombine.low %v3112_v58, %v1893_v45  ;;  %v1901_v13 = vcombine.high %v3112_v58, %v1893_v45 }
 0x668   : > { %v1896_v14 = vcombine.low %v3115_v59, %v1877_v6  ;;  %v1897_v16 = vcombine.high %v3115_v59, %v1877_v6  ;;  %v2034_v12 = vcombine.low %v3058_v35, %v3130_v20  ;;  %v2030_v48 = vcombine.low %v3061_v36, %v3133_v21 }
 0x669   : > { %2243 = vrot.lane.b32.xlu0 %v2037_v38, %s2698_s14  ;;  %2231 = vrot.lane.b32.xlu1 %v2033_v43, %s2698_s14  ;;  %v1762_v49 = vcombine.low %v3082_v41, %v3154_v39  ;;  %v1758_v58 = vcombine.low %v3085_v42, %v3157_v50  ;;  %v2170_v17 = vcombine.low %v3094_v46, %v3164_v52 }
 0x66a   : > { %v2166_v59 = vcombine.low %v3097_v47, %v3171_v55  ;;  %v1898_v35 = vcombine.low %v3106_v53, %v3187_v4  ;;  %v1894_v36 = vcombine.low %v3109_v54, %v3190_v44 }
 0x66d   : > { %2187 = vrot.lane.b32.xlu0 %v1763_v24, %s2701_s22  ;;  %2175 = vrot.lane.b32.xlu1 %v1759_v28, %s2701_s22 }
 0x671   : > { %2191 = vrot.lane.b32.xlu0 %v1764_v57, %s2700_s21  ;;  %2179 = vrot.lane.b32.xlu1 %v1760_v60, %s2700_s21 }
 0x675   : > { %2195 = vrot.lane.b32.xlu0 %v1765_v61, %s2698_s14  ;;  %2183 = vrot.lane.b32.xlu1 %v1761_v62, %s2698_s14 }
 0x679   : > { %2259 = vrot.lane.b32.xlu0 %v2171_v0, %s2701_s22  ;;  %2247 = vrot.lane.b32.xlu1 %v2167_v1, %s2701_s22 }
 0x67d   : > { %2263 = vrot.lane.b32.xlu0 %v2172_v2, %s2700_s21  ;;  %2251 = vrot.lane.b32.xlu1 %v2168_v5, %s2700_s21 }
 0x681   : > { %2211 = vrot.lane.b32.xlu0 %v1899_v9, %s2701_s22  ;;  %2199 = vrot.lane.b32.xlu1 %v1895_v10, %s2701_s22  ;;  %s2383_s22 = sshll.u32 %s352_s13, 6 }
 0x685   : > { %2215 = vrot.lane.b32.xlu0 %v1900_v11, %s2700_s21  ;;  %2203 = vrot.lane.b32.xlu1 %v1896_v14, %s2700_s21  ;;  %s2440_s21 = sshll.u32 %s2784_s5, 10 }
 0x686   : > { %s3291_s27 = scalar_lea.hbm %s3349_s10, %s2440_s21 }
 0x689   : > { %2219 = vrot.lane.b32.xlu0 %v1901_v13, %s2698_s14  ;;  %2207 = vrot.lane.b32.xlu1 %v1897_v16, %s2698_s14 }
 0x68d   : > { %2267 = vrot.lane.b32.xlu0 %v2173_v7, %s2698_s14  ;;  %2255 = vrot.lane.b32.xlu1 %v2169_v8, %s2698_s14  ;;  %s3250_s14 = scalar_lea.vmem [#allocation3], %s2383_s22 }
 0x68e   : > { %s2320_s19 = sshll.u32 %s3250_s14, 4  ;;  %s3293_s19 = int_to_ptr.vmem [resolvable:$true] %s2320_s19 }
 0x68f   : > { %s2628_s29 = scalar_lea.vmem %s3293_s19, 1024  ;;  %p2635_p0 = scmp.lt.s32.totalorder %s3293_s19, %s2633_s11 }
 0x690   : > { %p2629_p11 = scmp.ne.s32.totalorder %s3293_s19, %s2628_s29  ;;  %p2636_p1 = scmp.lt.s32.totalorder %s2634_s12, %s2628_s29 }
 0x692   : > { %p2630_p12 = pnand %p2629_p11, %p2801_p5  ;;  %p2637_p2 = por %p2636_p1, %p2635_p0 }
 0x694   : > { %p2631_p13 = pneg %p2630_p12 }
 0x696   : > { %p2638_p3 = pnand %p2637_p2, %p2631_p13 }
 0x6d3   : > { %v2236_v41 = vpop.permute.xlu0 %2235  ;;  %v2224_v42 = vpop.permute.xlu1 %2223 }
 0x6d4   : > { %v2288_v20 = vsel %vm2270_vm7, %v2034_v12, %v2236_v41  ;;  %v2285_v21 = vsel %vm2270_vm7, %v2030_v48, %v2224_v42 }
 0x6d7   : > { %v2240_v18 = vpop.permute.xlu0 %2239  ;;  %v2228_v19 = vpop.permute.xlu1 %2227 }
 0x6d8   : > { %v2289_v22 = vsel %vm2272_vm8, %v2288_v20, %v2240_v18  ;;  %v2286_v15 = vsel %vm2272_vm8, %v2285_v21, %v2228_v19 }
 0x6db   : > { %v2244_v23 = vpop.permute.xlu0 %2243  ;;  %v2232_v25 = vpop.permute.xlu1 %2231 }
 0x6dc   : > { %v2290_v26 = vsel %vm2274_vm9, %v2289_v22, %v2244_v23  ;;  %v2287_v27 = vsel %vm2274_vm9, %v2286_v15, %v2232_v25 }
 0x6dd   : > { %2302 = vst [vmem:[%s3250_s14 + $0x28] sm:$0xff] %v2290_v26  ;;  %2301 = vst [vmem:[%s3250_s14 + $0x20] sm:$0xff] %v2287_v27 }
 0x6df   : > { %v2188_v63 = vpop.permute.xlu0 %2187  ;;  %v2176_v29 = vpop.permute.xlu1 %2175 }
 0x6e0   : > { %v2276_v32 = vsel %vm2270_vm7, %v1762_v49, %v2188_v63  ;;  %v2271_v33 = vsel %vm2270_vm7, %v1758_v58, %v2176_v29 }
 0x6e3   : > { %v2192_v30 = vpop.permute.xlu0 %2191  ;;  %v2180_v31 = vpop.permute.xlu1 %2179 }
 0x6e4   : > { %v2277_v34 = vsel %vm2272_vm8, %v2276_v32, %v2192_v30  ;;  %v2273_v37 = vsel %vm2272_vm8, %v2271_v33, %v2180_v31 }
 0x6e7   : > { %v2196_v38 = vpop.permute.xlu0 %2195  ;;  %v2184_v43 = vpop.permute.xlu1 %2183 }
 0x6e8   : > { %v2278_v39 = vsel %vm2274_vm9, %v2277_v34, %v2196_v38  ;;  %v2275_v50 = vsel %vm2274_vm9, %v2273_v37, %v2184_v43 }
 0x6e9   : > { %2298 = vst [vmem:[%s3250_s14 + $0x8] sm:$0xff] %v2278_v39  ;;  %2297 = vst [vmem:[%s3250_s14] sm:$0xff] %v2275_v50 }
 0x6eb   : > { %v2260_v40 = vpop.permute.xlu0 %2259  ;;  %v2248_v51 = vpop.permute.xlu1 %2247 }
 0x6ec   : > { %v2294_v53 = vsel %vm2270_vm7, %v2170_v17, %v2260_v40  ;;  %v2291_v54 = vsel %vm2270_vm7, %v2166_v59, %v2248_v51 }
 0x6ef   : > { %v2264_v24 = vpop.permute.xlu0 %2263  ;;  %v2252_v28 = vpop.permute.xlu1 %2251 }
 0x6f0   : > { %v2295_v4 = vsel %vm2272_vm8, %v2294_v53, %v2264_v24  ;;  %v2292_v44 = vsel %vm2272_vm8, %v2291_v54, %v2252_v28 }
 0x6f3   : > { %v2212_v56 = vpop.permute.xlu0 %2211  ;;  %v2200_v57 = vpop.permute.xlu1 %2199 }
 0x6f4   : > { %v2282_v62 = vsel %vm2270_vm7, %v1898_v35, %v2212_v56  ;;  %v2279_v0 = vsel %vm2270_vm7, %v1894_v36, %v2200_v57 }
 0x6f7   : > { %v2216_v60 = vpop.permute.xlu0 %2215  ;;  %v2204_v61 = vpop.permute.xlu1 %2203 }
 0x6f8   : > { %v2283_v1 = vsel %vm2272_vm8, %v2282_v62, %v2216_v60  ;;  %v2280_v2 = vsel %vm2272_vm8, %v2279_v0, %v2204_v61 }
 0x6fb   : > { %v2220_v3 = vpop.permute.xlu0 %2219  ;;  %v2208_v45 = vpop.permute.xlu1 %2207 }
 0x6fc   : > { %v2284_v5 = vsel %vm2274_vm9, %v2283_v1, %v2220_v3  ;;  %v2281_v6 = vsel %vm2274_vm9, %v2280_v2, %v2208_v45 }
 0x6fd   : > { %2300 = vst [vmem:[%s3250_s14 + $0x18] sm:$0xff] %v2284_v5  ;;  %2299 = vst [vmem:[%s3250_s14 + $0x10] sm:$0xff] %v2281_v6 }
 0x6ff   : > { %v2268_v7 = vpop.permute.xlu0 %2267  ;;  %v2256_v8 = vpop.permute.xlu1 %2255 }
 0x700   : > { %v2296_v46 = vsel %vm2274_vm9, %v2295_v4, %v2268_v7  ;;  %v2293_v47 = vsel %vm2274_vm9, %v2292_v44, %v2256_v8 }
 0x701   : > { %2304 = vst [vmem:[%s3250_s14 + $0x38] sm:$0xff] %v2296_v46  ;;  %2303 = vst [vmem:[%s3250_s14 + $0x30] sm:$0xff] %v2293_v47 }
 0x702   : > { %2641 = shalt.err (!%p2638_p3)
}
 0x703   : > { %s2642_s13 = scalar_lea.hbm %s3291_s27, 1024  ;;  %s2646_s21 = scalar_lea.hbm %s3349_s10, 2048 }
 0x704   : > { %p2643_p4 = scmp.ne.s32.totalorder %s3291_s27, %s2642_s13  ;;  %p2647_p9 = scmp.lt.u32.totalorder %s3291_s27, %s3349_s10 }
 0x705   : > { %p2648_p10 = scmp.lt.u32.totalorder %s2646_s21, %s2642_s13  ;;  %p2650_p12 = scmp.lt.u32.totalorder %s2642_s13, %s3291_s27 }
 0x706   : > { %p2644_p7 = pnand %p2643_p4, %p2801_p5 }
 0x707   : > { %p2649_p11 = por %p2648_p10, %p2647_p9 }
 0x708   : > { %p2645_p8 = pneg %p2644_p7 }
 0x709   : > { %p2651_p13 = por %p2650_p12, %p2649_p11 }
 0x70b   : > { %p2652_p0 = pnand %p2651_p13, %p2645_p8 }
 0x70d   : > { %2655 = shalt.err (!%p2652_p0)
}
 0x70e   : > { %2554 = dma.vmem_to_hbm [thread:$0]  (%p2801_p5), %s3293_s19, 1024, %s3291_s27, %s2306_s28  }
 0x70f PF: > { %p2560_p1 = scmp.ge.s32.totalorder %s2690_s18, 2  ;;  %s2332_s29 = sand.u32 1, %s2678_s15  }
 0x710   : > { %s2333_s30 = scalar_lea.sflag [#allocation4], %s2332_s29 }
 0x711   : > { %p2557_p2 = pnand %p2560_p1, %p2805_p6 }
 0x713   : > { %2673 = dma.done.wait (!%p2557_p2), %s2333_s30, 1024  }
 0x714   : > { %2675 = vsyncadd (!%p2557_p2), %s2333_s30, 4294966272  ;;  %p22_p3 = scmp.ge.s32.totalorder %s2788_s20, 4   ;;  %s3352_s15 = smov %s2682_s16 }
 0x715   : > { %s3353_s16 = smov %s2686_s17  ;;  %s3354_s17 = smov %s2799_s23 }
 0x716   : > { %s3355_s18 = smov %s2788_s20  ;;  %24 = sbr.rel (!%p22_p3) target bundleno = 6 (0x6), region = 95 }
 0x71d   :  { %2338 = vsyncpa [#allocation4], 1 }
 0x71e   :  { %2340 = vsyncpa [#allocation4 + $0x1], 1 }

</bundles_post_ra>
